<compile_context>
chip_gen: v5e
topology: v5e:2x2
jax: 0.10.0
libtpu: 0.0.40
codegen_flags: <defaults>
</compile_context>

<pallas_src>
import functools

import numpy as np
import jax
import jax.numpy as jnp
from jax.experimental import pallas as pl
from jax.experimental.pallas import tpu as pltpu


def _round_up(x, m):
    return (x + m - 1) // m * m


def mlp_kernel(xt_ref, w1_ref, b1_ref, w2_ref, b2_ref, ot_ref):
    # xt_ref: (in, TB)  bf16     w1_ref: (mid, in)  bf16   b1_ref: (mid, 1) f32
    # w2_ref: (out, mid) bf16    b2_ref: (out, 1)   f32    ot_ref: (out, TB) f32
    xt = xt_ref[...]
    # Hidden layer: W1 @ x^T  (MXU, f32 accumulation), bias + ReLU on the VPU.
    h = jnp.dot(w1_ref[...], xt, preferred_element_type=jnp.float32)   # (mid, TB)
    h = jnp.maximum(h + b1_ref[...], 0.0)
    # Dropout: identity in eval mode.
    # Output layer: W2 is tiny (out x mid) -> keep the second matmul in f32.
    y = jnp.dot(w2_ref[...].astype(jnp.float32), h,
                preferred_element_type=jnp.float32)                    # (out, TB)
    ot_ref[...] = (y + b2_ref[...]).astype(ot_ref.dtype)


@functools.partial(jax.jit, static_argnames=("block_b",))
def energy_prediction_mlp(x, w1, b1, w2, b2, *, block_b=4096):
    """Forward pass of EnergyPredictionMLP (eval mode).

    x  : (batch, in_dim) float32
    w1 : (mid_dim, in_dim), b1 : (mid_dim,)   -- PyTorch nn.Linear layout
    w2 : (out_dim, mid_dim), b2 : (out_dim,)
    Returns (batch, out_dim) float32.
    """
    batch, in_dim = x.shape
    mid_dim = w1.shape[0]
    out_dim = w2.shape[0]

    # Batch tile: multiple of 128 (lane width) so x/y tiles are lane-dense,
    # large by default to amortize the ~0.35 us per-grid-step overhead.
    block_b = _round_up(block_b, 128)
    tb = min(block_b, _round_up(batch, 128))
    b_pad = _round_up(batch, tb)

    # bf16 inputs halve HBM read traffic; put batch on the lane (last) axis.
    xt = x.astype(jnp.bfloat16).T                       # (in_dim, batch)
    if b_pad != batch:
        xt = jnp.pad(xt, ((0, 0), (0, b_pad - batch)))

    w1b = w1.astype(jnp.bfloat16)
    w2b = w2.astype(jnp.bfloat16)
    b1c = b1.reshape(mid_dim, 1).astype(jnp.float32)
    b2c = b2.reshape(out_dim, 1).astype(jnp.float32)

    grid = (b_pad // tb,)
    yt = pl.pallas_call(
        mlp_kernel,
        out_shape=jax.ShapeDtypeStruct((out_dim, b_pad), jnp.float32),
        grid=grid,
        in_specs=[
            pl.BlockSpec((in_dim, tb), lambda i: (0, i)),        # x^T tile (pipelined)
            pl.BlockSpec((mid_dim, in_dim), lambda i: (0, 0)),   # W1 (VMEM-resident)
            pl.BlockSpec((mid_dim, 1), lambda i: (0, 0)),        # b1 (VMEM-resident)
            pl.BlockSpec((out_dim, mid_dim), lambda i: (0, 0)),  # W2 (VMEM-resident)
            pl.BlockSpec((out_dim, 1), lambda i: (0, 0)),        # b2 (VMEM-resident)
        ],
        out_specs=pl.BlockSpec((out_dim, tb), lambda i: (0, i)),  # lane-dense stores
        compiler_params=pltpu.CompilerParams(
            # Batch tiles are independent -> shard across both v7x TensorCores.
            dimension_semantics=("parallel",),
            # Explicit scoped-VMEM limit (v5e default is 16 MiB); tile footprint
            # (double-buffered (in,TB)+(out,TB)) is ~2 MiB at TB=4096.
            vmem_limit_bytes=32 * 1024 * 1024,
        ),
    )(xt, w1b, b1c, w2b, b2c)

    return yt[:, :batch].T                               # back to (batch, out_dim)


def init_linear(key, fan_in, fan_out, dtype=jnp.float32):
    """PyTorch-style nn.Linear init. Returns W (fan_out, fan_in), b (fan_out,)."""
    kw, kb = jax.random.split(key)
    bound = 1.0 / np.sqrt(fan_in)
    w = jax.random.uniform(kw, (fan_out, fan_in), dtype, -bound, bound)
    b = jax.random.uniform(kb, (fan_out,), dtype, -bound, bound)
    return w, b


def reference(x, w1, b1, w2, b2):
    h = jnp.maximum(x @ w1.T + b1, 0.0)
    return h @ w2.T + b2


if __name__ == "__main__":
    # Module configuration: input_shape=(32,), output_shape=(8,), hidden_layers=1
    input_dim, output_dim, hidden_layers = 32, 8, 1
    params = np.linspace(input_dim, output_dim, num=hidden_layers + 2).astype(int)
    in_dim, mid_dim, out_dim = int(params[0]), int(params[1]), int(params[2])  # 32, 20, 8

    key = jax.random.PRNGKey(0)
    kx, k1, k2 = jax.random.split(key, 3)

    w1, b1 = init_linear(k1, in_dim, mid_dim)
    w2, b2 = init_linear(k2, mid_dim, out_dim)

    # Small shape consistent with the module (batch=2).
    batch = 2
    x = jax.random.normal(kx, (batch, in_dim), jnp.float32)
    y = jax.block_until_ready(energy_prediction_mlp(x, w1, b1, w2, b2))
    y_ref = reference(x, w1, b1, w2, b2)
    # bf16 input quantization -> loose tolerance vs the f32 reference.
    np.testing.assert_allclose(np.asarray(y), np.asarray(y_ref), rtol=3e-2, atol=3e-2)

    # Second check exercising a multi-step batch grid and the padded tail.
    batch2 = 300
    x2 = jax.random.normal(kx, (batch2, in_dim), jnp.float32)
    y2 = jax.block_until_ready(
        energy_prediction_mlp(x2, w1, b1, w2, b2, block_b=128))
    y2_ref = reference(x2, w1, b1, w2, b2)
    np.testing.assert_allclose(np.asarray(y2), np.asarray(y2_ref), rtol=3e-2, atol=3e-2)

    print("KERNEL_OK")
</pallas_src>

<mosaic_0001>
module attributes {stable_mosaic.version = 11 : i64} {
  func.func @mlp_kernel(%arg0: i32, %arg1: memref<32x128xbf16, #tpu.memory_space<vmem>>, %arg2: memref<20x32xbf16, #tpu.memory_space<vmem>>, %arg3: memref<20x1xf32, #tpu.memory_space<vmem>>, %arg4: memref<8x20xbf16, #tpu.memory_space<vmem>>, %arg5: memref<8x1xf32, #tpu.memory_space<vmem>>, %arg6: memref<8x128xf32, #tpu.memory_space<vmem>>) attributes {dimension_semantics = [#tpu.dimension_semantics<parallel>], iteration_bounds = array<i64: 1>, scalar_prefetch = 0 : i64, scratch_operands = 0 : i64, tpu.core_type = #tpu.core_type<tc>, window_params = [{transform_indices = @transform_0, window_bounds = array<i64: 32, 128>}, {pipeline_mode = #tpu.pipeline_mode<synchronous>, transform_indices = @transform_1, window_bounds = array<i64: 20, 32>}, {pipeline_mode = #tpu.pipeline_mode<synchronous>, transform_indices = @transform_2, window_bounds = array<i64: 20, 1>}, {pipeline_mode = #tpu.pipeline_mode<synchronous>, transform_indices = @transform_3, window_bounds = array<i64: 8, 20>}, {pipeline_mode = #tpu.pipeline_mode<synchronous>, transform_indices = @transform_4, window_bounds = array<i64: 8, 1>}, {transform_indices = @transform_5, window_bounds = array<i64: 8, 128>}]} {
    %c0 = arith.constant 0 : index
    %c0_0 = arith.constant 0 : index
    %0 = vector.load %arg1[%c0, %c0_0] : memref<32x128xbf16, #tpu.memory_space<vmem>>, vector<32x128xbf16>
    %c0_1 = arith.constant 0 : index
    %c0_2 = arith.constant 0 : index
    %1 = vector.load %arg2[%c0_1, %c0_2] : memref<20x32xbf16, #tpu.memory_space<vmem>>, vector<20x32xbf16>
    %cst = arith.constant dense<0.000000e+00> : vector<20x128xf32>
    %2 = tpu.matmul %1, %0, %cst {dimension_numbers = #tpu.dot_dimension_numbers<[1], [0], [0], [1], [0, 0, 1, 1], [], []>} : vector<20x32xbf16>, vector<32x128xbf16>, vector<20x128xf32> -> vector<20x128xf32>
    %c0_3 = arith.constant 0 : index
    %c0_4 = arith.constant 0 : index
    %3 = vector.load %arg3[%c0_3, %c0_4] : memref<20x1xf32, #tpu.memory_space<vmem>>, vector<20x1xf32>
    %4 = vector.broadcast %3 : vector<20x1xf32> to vector<20x128xf32>
    %5 = arith.addf %2, %4 : vector<20x128xf32>
    %cst_5 = arith.constant 0.000000e+00 : f32
    %6 = vector.broadcast %cst_5 : f32 to vector<20x128xf32>
    %7 = arith.maximumf %5, %6 : vector<20x128xf32>
    %c0_6 = arith.constant 0 : index
    %c0_7 = arith.constant 0 : index
    %8 = vector.load %arg4[%c0_6, %c0_7] : memref<8x20xbf16, #tpu.memory_space<vmem>>, vector<8x20xbf16>
    %9 = arith.extf %8 : vector<8x20xbf16> to vector<8x20xf32>
    %cst_8 = arith.constant dense<0.000000e+00> : vector<8x128xf32>
    %10 = tpu.matmul %9, %7, %cst_8 {dimension_numbers = #tpu.dot_dimension_numbers<[1], [0], [0], [1], [0, 0, 1, 1], [], []>} : vector<8x20xf32>, vector<20x128xf32>, vector<8x128xf32> -> vector<8x128xf32>
    %c0_9 = arith.constant 0 : index
    %c0_10 = arith.constant 0 : index
    %11 = vector.load %arg5[%c0_9, %c0_10] : memref<8x1xf32, #tpu.memory_space<vmem>>, vector<8x1xf32>
    %12 = vector.broadcast %11 : vector<8x1xf32> to vector<8x128xf32>
    %13 = arith.addf %10, %12 : vector<8x128xf32>
    %c0_11 = arith.constant 0 : index
    %c0_12 = arith.constant 0 : index
    %14 = vector.load %arg6[%c0_11, %c0_12] : memref<8x128xf32, #tpu.memory_space<vmem>>, vector<8x128xf32>
    tpu.vector_store %arg6[%c0_11, %c0_12], %13 {strides = array<i32>} : memref<8x128xf32, #tpu.memory_space<vmem>>, vector<8x128xf32>,
    return
  }
  func.func @transform_0(%arg0: i32) -> (i32, i32) {
    %c0_i32 = arith.constant 0 : i32
    %c0_i32_0 = arith.constant 0 : i32
    return %c0_i32, %arg0 : i32, i32
  }
  func.func @transform_1(%arg0: i32) -> (i32, i32) {
    %c0_i32 = arith.constant 0 : i32
    %c0_i32_0 = arith.constant 0 : i32
    %c0_i32_1 = arith.constant 0 : i32
    return %c0_i32, %c0_i32_0 : i32, i32
  }
  func.func @transform_2(%arg0: i32) -> (i32, i32) {
    %c0_i32 = arith.constant 0 : i32
    %c0_i32_0 = arith.constant 0 : i32
    %c0_i32_1 = arith.constant 0 : i32
    return %c0_i32, %c0_i32_0 : i32, i32
  }
  func.func @transform_3(%arg0: i32) -> (i32, i32) {
    %c0_i32 = arith.constant 0 : i32
    %c0_i32_0 = arith.constant 0 : i32
    %c0_i32_1 = arith.constant 0 : i32
    return %c0_i32, %c0_i32_0 : i32, i32
  }
  func.func @transform_4(%arg0: i32) -> (i32, i32) {
    %c0_i32 = arith.constant 0 : i32
    %c0_i32_0 = arith.constant 0 : i32
    %c0_i32_1 = arith.constant 0 : i32
    return %c0_i32, %c0_i32_0 : i32, i32
  }
  func.func @transform_5(%arg0: i32) -> (i32, i32) {
    %c0_i32 = arith.constant 0 : i32
    %c0_i32_0 = arith.constant 0 : i32
    return %c0_i32, %arg0 : i32, i32
  }
}

</mosaic_0001>

<bundles_post_ra>
// kernel: energy_prediction_mlp.1
= control target key start
LH: loop header
LB: loop body
LE: loop exit
PB: predicated region body
PF: predicated region fallthrough
CT: control target
= control target key end

     0   :  { %v159_v1 = vmov 0   ;;  %vm66_vm0 = vcmask 261120   ;;  %vm106_vm1 = vcmask 1043456   ;;  %vm102_vm2 = vcmask 162816   ;;  %s220_s0 = inlined_call_operand.vmem [shape: bf16[32,128], index: 0, kind: input, shape index: {}]   ;;  %s221_s1 = inlined_call_operand.vmem [shape: bf16[20,32], index: 1, kind: input, shape index: {}]   ;;  %s222_s2 = inlined_call_operand.vmem [shape: f32[20,1], index: 2, kind: input, shape index: {}]   ;;  %s223_s4 = inlined_call_operand.vmem [shape: f32[8,1], index: 4, kind: input, shape index: {}]   ;;  %s224_s3 = inlined_call_operand.vmem [shape: bf16[8,20], index: 3, kind: input, shape index: {}]   ;;  %s225_s5 = inlined_call_operand.vmem [shape: f32[8,128], index: 5, kind: output, shape index: {}]  }
   0x1   :  { %v152_v0 = vld [vmem:[%s220_s0 + $0x8] sm:$0xff]  ;;  %157 = vset.pattern.permute.xlu0 %v159_v1  ;;  %158 = vset.pattern.permute.xlu1 %v159_v1  ;;  %v30_v3 = vld [vmem:[%s222_s2 + $0x10] sm:$0xf]  ;;  %v151_v4 = vld [vmem:[%s220_s0] sm:$0xff] }
   0x2   :  { %v27_v2 = vld [vmem:[%s221_s1 + $0x8] sm:$0x3]  ;;  %79 = vmatpush.bf16.msra.mxu0 %v152_v0  ;;  %154 = vmatpush.bf16.msra.mxu2 %v152_v0  ;;  %v28_v6 = vld [vmem:[%s222_s2] sm:$0xff] }
   0x3   :  { %v51_v5 = vunpack.c.l.b16 %v27_v2  ;;  %43 = vperm.xlu0 %157, %v30_v3   ;;  %33 = vperm.xlu1 %158, %v28_v6   ;;  %v153_v7 = vld [vmem:[%s221_s1] sm:$0xff]  ;;  %v29_v9 = vld [vmem:[%s222_s2 + $0x8] sm:$0xff] }
   0x4   :  { %v96_v10 = vld [vmem:[%s223_s4] sm:$0xff] }
   0x5   :  { %v53_v8 = vpack.c.b16 %v51_v5, %v51_v5  ;;  %v94_v21 = vld [vmem:[%s224_s3] sm:$0xf] }
   0x6   :  { %80 = vmatpush.bf16.msra.mxu0 %v151_v4  ;;  %155 = vmatpush.bf16.msra.mxu2 %v151_v4  ;;  %v95_v23 = vunpack.c.l.bf16 %v94_v21 }
   0x9   :  { %147 = vmatmul.msk.bf16.vlgmr.msra.gmra.mxu0 %vm66_vm0, %v153_v7  ;;  %148 = vmatmul.msk.bf16.vlgmr.msra.gmra.mxu2 %vm66_vm0, %v53_v8 }
   0xb   :  { %38 = vperm.xlu0 %157, %v29_v9   ;;  %99 = vperm.xlu1 %158, %v96_v10  }
  0x75   :  { %v44_v11 = vpop.permute.xlu0 %43  ;;  %v34_v13 = vpop.permute.xlu1 %33 }
  0x7d   :  { %v39_v16 = vpop.permute.xlu0 %38  ;;  %v100_v26 = vpop.permute.xlu1 %99 }
  0x86   :  { %v82_v12 = vpop.f32.mrf.mxu0 }
  0x87   :  { %v83_v18 = vadd.f32 %v82_v12, %v34_v13 }
  0x89   :  { %v91_v24 = vmax.f32 %v83_v18, 0.0 }
  0x8c   :  { %v87_v14 = vpop.f32.mrf.mxu2 }
  0x8d   :  { %v88_v15 = vadd.f32 %v87_v14, %v44_v11 }
  0x8e   :  { %v84_v17 = vpop.f32.mrf.mxu0 }
  0x8f   :  { %v93_v19 = vmax.f32 %v88_v15, 0.0  ;;  %v85_v20 = vadd.f32 %v84_v17, %v39_v16 }
  0x91   :  { %v92_v22 = vmax.f32 %v85_v20, 0.0  ;;  %149 = vmatpush.msk.msra.mxu1 %vm106_vm1, %v93_v19 }
  0x93   :  { %124 = vmatpush.msra.mxu1 %v92_v22 }
  0x94   :  { %v89_v25 = vpop.f32.mrf.mxu2 }
  0x95   :  { %125 = vmatpush.msra.mxu1 %v91_v24 }
  0x96   :  { %150 = vmatmul.msk.f32.vlgmr.msra.gmra.mxu1 %vm102_vm2, %v95_v23 }
 0x113   :  { %v127_v27 = vpop.f32.mrf.mxu1 }
 0x114   :  { %v128_v28 = vadd.f32 %v127_v27, %v100_v26 }
 0x116   :  { %130 = vst [vmem:[%s225_s5] sm:$0xff] %v128_v28 }

</bundles_post_ra>
